<compile_context>
chip_gen: v6e
topology: v6e:2x2x1
jax: 0.10.0
libtpu: 0.0.40
codegen_flags: <defaults>
</compile_context>

<pallas_src>
import math

import jax
import jax.numpy as jnp
from jax.experimental import pallas as pl
from jax.experimental.pallas import tpu as pltpu

_INV_SQRT2 = 1.0 / math.sqrt(2.0)


def bert_intermediate_kernel(x_ref, w_ref, b_ref, o_ref):
    # In-kernel bf16 cast of the activation tile (no-op if already bf16);
    # MXU matmul with f32 accumulation.
    x = x_ref[...].astype(jnp.bfloat16)
    y = jnp.dot(x, w_ref[...], preferred_element_type=jnp.float32)
    y = y + b_ref[...]                                   # (1, tile_n) broadcasts over rows
    # BERT gelu: x * 0.5 * (1 + erf(x / sqrt(2)))  -- divide replaced by multiply.
    act = y * 0.5 * (1.0 + jax.lax.erf(y * jnp.float32(_INV_SQRT2)))
    o_ref[...] = act.astype(o_ref.dtype)


def prepare_bert_intermediate_params(weight, bias):
    """One-time (model-init) prep: torch Linear weight [I, H] -> [H, I] in bf16.

    Doing the transpose + cast here keeps the per-call hot path free of an
    extra HBM pass over the weight.
    """
    w_t = jnp.asarray(weight).T.astype(jnp.bfloat16)          # [H, I]
    b = jnp.asarray(bias, dtype=jnp.float32).reshape(1, -1)   # [1, I]
    return w_t, b


def _divisor_tiles_n(I):
    cands = [c for c in (4096, 2048, 1024, 512, 256, 128) if c <= I and I % c == 0]
    if not cands:
        cands = [I]  # odd intermediate size: full-dim block (allowed: equals array dim)
    return cands


def _footprint(tile_m, tile_n, H, x_bytes, out_bytes):
    # Double-buffered (default BlockSpec pipelining) VMEM bytes per step.
    x_buf = tile_m * H * x_bytes
    w_buf = H * tile_n * 2          # bf16 weight
    b_buf = tile_n * 4              # f32 bias
    o_buf = tile_m * tile_n * out_bytes
    return 2 * (x_buf + w_buf + b_buf + o_buf)


def _select_tiles(M, H, I, x_bytes, out_bytes, budget=28 * 1024 * 1024):
    """Largest tile_n (fewest X re-reads), then largest MXU-friendly tile_m that fits."""
    m_ceil = ((M + 7) // 8) * 8
    tn_cands = _divisor_tiles_n(I)
    tm_cands = [t for t in (512, 256, 128, 64, 32, 16, 8) if t <= m_ceil] or [m_ceil]
    min_good_tm = min(128, m_ceil)
    fallback = None
    for tn in tn_cands:
        for tm in tm_cands:
            if _footprint(tm, tn, H, x_bytes, out_bytes) <= budget:
                if tm >= min_good_tm:
                    return tm, tn
                if fallback is None:
                    fallback = (tm, tn)
                break
    if fallback is not None:
        return fallback
    return tm_cands[-1], tn_cands[-1]


def bert_intermediate(hidden_states, w_t, bias2d, *, tile_m=None, tile_n=None):
    """hidden_states: [B, S, H]; w_t: [H, I] (prepped, bf16); bias2d: [1, I] f32."""
    B, S, H = hidden_states.shape
    I = w_t.shape[1]
    M = B * S
    out_dtype = hidden_states.dtype
    x_bytes = jnp.dtype(hidden_states.dtype).itemsize
    out_bytes = jnp.dtype(out_dtype).itemsize

    auto_tm, auto_tn = _select_tiles(M, H, I, x_bytes, out_bytes)
    if tile_m is None:
        tile_m = auto_tm
    if tile_n is None:
        tile_n = auto_tn
    if I % tile_n != 0:
        tile_n = I  # full-dim block is always legal

    # M tiling: multiple of 8, padded so any batch*seq works (free view otherwise).
    tile_m = max(8, min(tile_m, ((M + 7) // 8) * 8))
    num_m = pl.cdiv(M, tile_m)
    M_pad = num_m * tile_m
    num_n = I // tile_n

    x = hidden_states.reshape(M, H)
    if M_pad != M:
        x = jnp.pad(x, ((0, M_pad - M), (0, 0)))

    cost = pl.CostEstimate(
        flops=2 * M_pad * H * I,
        transcendentals=M_pad * I,
        bytes_accessed=(num_n * M_pad * H * x_bytes      # X streamed once per N tile
                        + H * I * 2                      # W read once
                        + I * 4
                        + M_pad * I * out_bytes),
    )

    vmem_limit = min(48 * 1024 * 1024,
                     max(16 * 1024 * 1024,
                         _footprint(tile_m, tile_n, H, x_bytes, out_bytes) + 8 * 1024 * 1024))

    out = pl.pallas_call(
        bert_intermediate_kernel,
        out_shape=jax.ShapeDtypeStruct((M_pad, I), out_dtype),
        grid_spec=pltpu.PrefetchScalarGridSpec(
            num_scalar_prefetch=0,
            # j over I (outer), i over M (innermost): the W^T / bias tiles stay
            # resident across the inner M loop (W read from HBM exactly once
            # per outer step); only X and output tiles stream.
            grid=(num_n, num_m),
            in_specs=[
                pl.BlockSpec((tile_m, H), lambda j, i: (i, 0)),   # X tile
                pl.BlockSpec((H, tile_n), lambda j, i: (0, j)),   # W^T tile
                pl.BlockSpec((1, tile_n), lambda j, i: (0, j)),   # bias tile
            ],
            out_specs=pl.BlockSpec((tile_m, tile_n), lambda j, i: (i, j)),
        ),
        compiler_params=pltpu.CompilerParams(
            dimension_semantics=("parallel", "parallel"),
            vmem_limit_bytes=vmem_limit,
        ),
        cost_estimate=cost,
    )(x, w_t, bias2d)

    if M_pad != M:
        out = out[:M]
    return out.reshape(B, S, I)


if __name__ == "__main__":
    # Small BERT-like config: hidden_size=32, intermediate_size=128
    B, S, H, I = 2, 8, 32, 128

    key = jax.random.PRNGKey(0)
    k_x, k_w, k_b = jax.random.split(key, 3)

    hidden_states = jax.random.normal(k_x, (B, S, H), dtype=jnp.float32)
    weight = jax.random.normal(k_w, (I, H), dtype=jnp.float32) * 0.02  # torch Linear: [out, in]
    bias = jax.random.normal(k_b, (I,), dtype=jnp.float32) * 0.02

    # One-time param prep (transpose + bf16 cast), then the tiled kernel.
    w_t, b2d = prepare_bert_intermediate_params(weight, bias)
    # Small tiles here purely so the tiny test shape exercises a multi-step grid;
    # real BERT shapes use the auto-selected, MXU-aligned tiles.
    out = bert_intermediate(hidden_states, w_t, b2d, tile_m=8, tile_n=128)
    out = jax.block_until_ready(out)
    assert out.shape == (B, S, I)

    # Reference matching the kernel's pipeline (bf16 operands, f32 accumulate).
    x32 = hidden_states.reshape(-1, H).astype(jnp.bfloat16).astype(jnp.float32)
    w32 = w_t.astype(jnp.float32)
    y = x32 @ w32 + bias
    y_ref = (y * 0.5 * (1.0 + jax.lax.erf(y * jnp.float32(_INV_SQRT2)))).reshape(B, S, I)
    assert jnp.allclose(out, y_ref, atol=1e-5, rtol=1e-5), float(jnp.abs(out - y_ref).max())

    # Loose sanity check against the full-precision torch semantics.
    yf = hidden_states @ weight.T + bias
    yf = yf * 0.5 * (1.0 + jax.lax.erf(yf / jnp.float32(math.sqrt(2.0))))
    assert jnp.allclose(out, yf, atol=2e-2, rtol=2e-2)

    # Also exercise the auto-tiling path once (same tiny shape, grid (1,1) or (1,2)).
    out2 = jax.block_until_ready(bert_intermediate(hidden_states, w_t, b2d))
    assert jnp.allclose(out2, out)

    print("KERNEL_OK")
</pallas_src>

<mosaic_0001>
module attributes {stable_mosaic.version = 11 : i64} {
  func.func @bert_intermediate_kernel(%arg0: i32, %arg1: i32, %arg2: memref<8x32xf32, #tpu.memory_space<vmem>>, %arg3: memref<32x128xbf16, #tpu.memory_space<vmem>>, %arg4: memref<1x128xf32, #tpu.memory_space<vmem>>, %arg5: memref<8x128xf32, #tpu.memory_space<vmem>>) attributes {dimension_semantics = [#tpu.dimension_semantics<parallel>, #tpu.dimension_semantics<parallel>], iteration_bounds = array<i64: 1, 2>, scalar_prefetch = 0 : i64, scratch_operands = 0 : i64, tpu.core_type = #tpu.core_type<tc>, window_params = [{transform_indices = @transform_0, window_bounds = array<i64: 8, 32>}, {transform_indices = @transform_1, window_bounds = array<i64: 32, 128>}, {transform_indices = @transform_2, window_bounds = array<i64: 1, 128>}, {transform_indices = @transform_3, window_bounds = array<i64: 8, 128>}]} {
    %c0 = arith.constant 0 : index
    %c0_0 = arith.constant 0 : index
    %0 = vector.load %arg2[%c0, %c0_0] : memref<8x32xf32, #tpu.memory_space<vmem>>, vector<8x32xf32>
    %1 = arith.truncf %0 : vector<8x32xf32> to vector<8x32xbf16>
    %c0_1 = arith.constant 0 : index
    %c0_2 = arith.constant 0 : index
    %2 = vector.load %arg3[%c0_1, %c0_2] : memref<32x128xbf16, #tpu.memory_space<vmem>>, vector<32x128xbf16>
    %cst = arith.constant dense<0.000000e+00> : vector<8x128xf32>
    %3 = tpu.matmul %1, %2, %cst {dimension_numbers = #tpu.dot_dimension_numbers<[1], [0], [0], [1], [0, 0, 1, 1], [], []>} : vector<8x32xbf16>, vector<32x128xbf16>, vector<8x128xf32> -> vector<8x128xf32>
    %c0_3 = arith.constant 0 : index
    %c0_4 = arith.constant 0 : index
    %4 = vector.load %arg4[%c0_3, %c0_4] : memref<1x128xf32, #tpu.memory_space<vmem>>, vector<1x128xf32>
    %5 = vector.broadcast %4 : vector<1x128xf32> to vector<8x128xf32>
    %6 = arith.addf %3, %5 : vector<8x128xf32>
    %cst_5 = arith.constant 5.000000e-01 : f32
    %7 = vector.broadcast %cst_5 : f32 to vector<8x128xf32>
    %8 = arith.mulf %6, %7 : vector<8x128xf32>
    %cst_6 = arith.constant 0.707106769 : f32
    %9 = vector.broadcast %cst_6 : f32 to vector<8x128xf32>
    %10 = arith.mulf %6, %9 : vector<8x128xf32>
    %11 = math.erf %10 : vector<8x128xf32>
    %cst_7 = arith.constant 1.000000e+00 : f32
    %12 = vector.broadcast %cst_7 : f32 to vector<8x128xf32>
    %13 = arith.addf %12, %11 : vector<8x128xf32>
    %14 = arith.mulf %8, %13 : vector<8x128xf32>
    %c0_8 = arith.constant 0 : index
    %c0_9 = arith.constant 0 : index
    %15 = vector.load %arg5[%c0_8, %c0_9] : memref<8x128xf32, #tpu.memory_space<vmem>>, vector<8x128xf32>
    tpu.vector_store %arg5[%c0_8, %c0_9], %14 {strides = array<i32>} : memref<8x128xf32, #tpu.memory_space<vmem>>, vector<8x128xf32>,
    return
  }
  func.func @transform_0(%arg0: i32, %arg1: i32) -> (i32, i32) {
    %c0_i32 = arith.constant 0 : i32
    %c0_i32_0 = arith.constant 0 : i32
    return %arg1, %c0_i32 : i32, i32
  }
  func.func @transform_1(%arg0: i32, %arg1: i32) -> (i32, i32) {
    %c0_i32 = arith.constant 0 : i32
    %c0_i32_0 = arith.constant 0 : i32
    return %c0_i32, %arg0 : i32, i32
  }
  func.func @transform_2(%arg0: i32, %arg1: i32) -> (i32, i32) {
    %c0_i32 = arith.constant 0 : i32
    %c0_i32_0 = arith.constant 0 : i32
    return %c0_i32, %arg0 : i32, i32
  }
  func.func @transform_3(%arg0: i32, %arg1: i32) -> (i32, i32) {
    %c0_i32 = arith.constant 0 : i32
    return %arg1, %arg0 : i32, i32
  }
}

</mosaic_0001>

<bundles_post_ra>
// kernel: tpu_custom_call.1
= control target key start
LH: loop header
LB: loop body
LE: loop exit
PB: predicated region body
PF: predicated region fallthrough
CT: control target
= control target key end

     0   :  { %8 = vsyncpa [#allocation3], 0  ;;  %s883_s0 = inlined_call_operand.hbm [shape: f32[16,32], index: 0, kind: input, shape index: {}]   ;;  %s884_s1 = inlined_call_operand.hbm [shape: bf16[32,128], index: 1, kind: input, shape index: {}]   ;;  %s885_s2 = inlined_call_operand.vmem [shape: f32[1,128], index: 2, kind: input, shape index: {}]   ;;  %s886_s3 = inlined_call_operand.hbm [shape: f32[16,128], index: 3, kind: output, shape index: {}]  }
   0x1   :  { %10 = vsyncpa [#allocation3 + $0x1], 0 }
   0x2   :  { %11 = vsyncpa [#allocation6], 0 }
   0x3   :  { %12 = vsyncpa [#allocation4], 0 }
   0x4   :  { %14 = vsyncpa [#allocation4 + $0x1], 0  ;;  %s709_s12 = smov 0   ;;  %s711_s13 = smov 0  }
   0x5   :  { %s713_s14 = smov 0   ;;  %s715_s15 = smov 0  }
   0x6   :  { %s717_s16 = smov 0   ;;  %s719_s17 = smov 0  }
   0x7 LB: > { %s430_s18 = sadd.s32 4294967295, %s680_s17   ;;  %s431_s19 = sadd.s32 4294967294, %s680_s17   ;;  %s680_s17 = sphi %s719_s17, %s20_s17   ;;  %s676_s16 = sphi %s717_s16, %s904_s16   ;;  %s672_s15 = sphi %s715_s15, %s903_s15   ;;  %s668_s14 = sphi %s713_s14, %s902_s14   ;;  %s664_s13 = sphi %s711_s13, %s901_s13   ;;  %s660_s12 = sphi %s709_s12, %s900_s12  }
   0x8   : > { %p52_p0 = scmp.ne.s32.totalorder %s664_s13, %s660_s12  ;;  %p743_p1 = scmp.eq.s32.totalorder %s430_s18, 0 }
   0x9   : > { %p747_p2 = scmp.eq.s32.totalorder %s430_s18, 1  ;;  %p136_p3 = scmp.eq.s32.totalorder %s431_s19, 1 }
   0xa   : > { %p753_p4 = por %p743_p1, %p52_p0  ;;  %p432_p5 = scmp.ge.s32.totalorder %s680_s17, 1 }
   0xb   : > { %p758_p6 = por %p136_p3, %p52_p0  ;;  %p143_p7 = scmp.lt.s32.totalorder %s680_s17, 3 }
   0xc   : > { %s890_s22 = scalar_select %p753_p4, 1, 0 }
   0xd   : > { %s891_s23 = scalar_select %p758_p6, 1, 0 }
   0xe   : > { %p763_p8 = pnand %p432_p5, %p143_p7  ;;  %s682_s25 = smov [#allocation5]  }
   0xf   : > { %s157_s26 = sshll.u32 %s682_s25, 4  ;;  %s29_s28 = sadd.s32 1, %s676_s16  ;;  %s158_s26 = int_to_ptr.vmem [resolvable:$true] %s157_s26 }
  0x10   : > { %p469_p9 = pneg %p763_p8  ;;  %s553_s29 = scalar_lea.vmem %s158_s26, 256 }
  0x11   : > { %p554_p13 = scmp.ne.s32.totalorder %s158_s26, %s553_s29  ;;  %p561_p5 = scmp.lt.s32.totalorder %s158_s26, %s158_s26 }
  0x12   : > { %p772_p11 = pnand %p469_p9, %p743_p1  ;;  %p562_p7 = scmp.lt.s32.totalorder %s553_s29, %s553_s29 }
  0x14   : > { %p544_p12 = pneg %p772_p11  ;;  %p563_p6 = por %p562_p7, %p561_p5 }
  0x16   : > { %p556_p0 = pnand %p554_p13, %p544_p12 }
  0x18   : > { %p557_p3 = pneg %p556_p0 }
  0x1a   : > { %p564_p4 = pnand %p563_p6, %p557_p3 }
  0x1c   : > { %567 = shalt.err (!%p564_p4)
}
  0x1d   : > { %s683_s30 = smov 64   ;;  %s684_s4 = smov 4  }
  0x1e   : > { %472 = dma.hbm_to_vmem [thread:$0]  (!%p772_p11), %s884_s1, 256, %s158_s26, [#allocation6], %s683_s30, %s683_s30, %s684_s4  }
  0x1f   : > { %p30_p6 = scmp.ge.s32.totalorder %s29_s28, 2  ;;  %s39_s7 = sadd.s32 1, %s668_s14 }
  0x20   : > { %p46_p4 = scmp.ne.s32.totalorder %s668_s14, %s664_s13  ;;  %p47_p9 = scmp.eq.s32.totalorder %s680_s17, 0 }
  0x21   : > { %s906_s28 = smov (%p30_p6, %s29_s28), 0  ;;  %p482_p0 = scmp.lt.s32.totalorder %s680_s17, 2 }
  0x22   : > { %p790_p12 = por %p47_p9, %p46_p4  ;;  %p796_p13 = por %p747_p2, %p46_p4 }
  0x23   : > { %s36_s10 = ssub.s32 %s676_s16, %s906_s28  ;;  %s177_s11 = sand.u32 1, %s668_s14  }
  0x24   : > { %p37_p11 = scmp.eq.s32.totalorder %s36_s10, 0  ;;  %s436_s18 = sshll.u32 %s177_s11, 3 }
  0x25   : > { %s437_s25 = sshll.u32 %s676_s16, 7  ;;  %s181_s30 = scalar_lea.vmem [#allocation2], %s436_s18 }
  0x26   : > { %s805_s19 = scalar_select %p37_p11, %s668_s14, %s39_s7  }
  0x27   : > { %s186_s29 = scalar_lea.hbm %s883_s0, %s437_s25  ;;  %s188_s4 = sshll.u32 %s181_s30, 4  ;;  %s189_s4 = int_to_ptr.vmem [resolvable:$true] %s188_s4 }
  0x28   : > { %p813_p2 = pnand %p482_p0, %p790_p12  ;;  %s178_s5 = scalar_lea.sflag [#allocation3], %s177_s11 }
  0x29   : > { %s581_s6 = scalar_lea.vmem %s189_s4, 128  ;;  %s685_s7 = smov [#allocation2]  }
  0x2a   : > { %p570_p3 = pneg %p813_p2  ;;  %p582_p5 = scmp.ne.s32.totalorder %s189_s4, %s581_s6 }
  0x2b   : > { %s586_s10 = sshll.u32 %s685_s7, 4  ;;  %s587_s10 = int_to_ptr.vmem [resolvable:$false] %s586_s10 }
  0x2c   : > { %p584_p7 = pnand %p582_p5, %p570_p3  ;;  %s588_s25 = scalar_lea.vmem %s587_s10, 256 }
  0x2d   : > { %p589_p4 = scmp.lt.s32.totalorder %s189_s4, %s587_s10  ;;  %p590_p9 = scmp.lt.s32.totalorder %s588_s25, %s581_s6 }
  0x2e   : > { %p585_p6 = pneg %p584_p7 }
  0x2f   : > { %p591_p11 = por %p590_p9, %p589_p4 }
  0x31   : > { %p592_p10 = pnand %p591_p11, %p585_p6 }
  0x33   : > { %595 = shalt.err (!%p592_p10)
}
  0x34   : > { %476 = dma.hbm_to_vmem [thread:$0]  (!%p813_p2), %s186_s29, 128, %s189_s4, %s178_s5  }
  0x35   : > { %197 = sbr.rel (%p763_p8) target bundleno = 298 (0x12a), region = 32  ;;  %s824_s8 = sand.u32 (!%p763_p8), 1, %s664_s13  }
  0x36   : > { %s439_s11 = sshll.u32 (!%p763_p8), %s824_s8, 3  ;;  %s200_s18 = scalar_lea.sflag (!%p763_p8), [#allocation3], %s824_s8 }
  0x37   : > { %s203_s26 = scalar_lea.vmem (!%p763_p8), [#allocation2], %s439_s11  ;;  %p897_p12 = scmp.ne.s32.totalorder (!%p763_p8), %s890_s22, 0 }
  0x3a   : > { %647 = dma.done.wait (%p897_p12), %s200_s18, 128  }
  0x3b   : > { %649 = vsyncadd (%p897_p12), %s200_s18, 4294967168 }
  0x3c   : > { %651 = dma.done.wait (%p743_p1), [#allocation6], 256  }
  0x3d   : > { %653 = vsyncadd (%p743_p1), [#allocation6], 4294967040  ;;  %v686_v0 = vmov 0.0   ;;  %vm687_vm0 = vmmov 0   ;;  %v538_v1 = vld [vmem:[#allocation5 + $0x8] sm:$0xff]   ;;  %v539_v2 = vld [vmem:[#allocation5] sm:$0xff]  }
  0x3e   : > { %453 = vmatprep.subr.bf16.mxu0 %v686_v0  ;;  %457 = vmatprep.mubr.msk.bf16.mxu0 %vm687_vm0, %v686_v0  ;;  %v237_v3 = vld [vmem:[%s203_s26] sm:$0xff]  ;;  %vm262_vm1 = vcmask 261120   ;;  %s447_s20 = sshll.u32 %s672_s15, 7  ;;  %s232_s27 = scalar_lea.vmem [#allocation7], %s439_s11 }
  0x3f   : > { %454 = vmatpush3.bf16.msra.mxu0 %v538_v1  ;;  %v238_v4 = vpack.c.bf16 %v237_v3, %v237_v3  ;;  %v442_v5 = vld [vmem:[%s885_s2] ss:$0 sm:$0xff]  ;;  %s327_s29 = sshll.u32 %s232_s27, 4  ;;  %s325_s21 = scalar_lea.hbm %s886_s3, %s447_s20  ;;  %s328_s29 = int_to_ptr.vmem [resolvable:$true] %s327_s29 }
  0x40   : > { %455 = vmatprep.subr.bf16.mxu0 %v686_v0  ;;  %s313_s5 = scalar_lea.sflag [#allocation4], %s824_s8  ;;  %s596_s6 = scalar_lea.vmem %s328_s29, 128 }
  0x41   : > { %p597_p1 = scmp.ne.s32.totalorder %s328_s29, %s596_s6  ;;  %s688_s7 = smov [#allocation7]  }
  0x42   : > { %s600_s15 = sshll.u32 %s688_s7, 4  ;;  %s601_s15 = int_to_ptr.vmem [resolvable:$false] %s600_s15 }
  0x43   : > { %456 = vmatpush3.bf16.msra.mxu0 %v539_v2  ;;  %p598_p8 = pnand %p597_p1, %p796_p13  ;;  %s602_s10 = scalar_lea.vmem %s601_s15, 256 }
  0x44   : > { %p603_p0 = scmp.lt.s32.totalorder %s328_s29, %s601_s15  ;;  %p604_p2 = scmp.lt.s32.totalorder %s602_s10, %s596_s6 }
  0x45   : > { %p599_p10 = pneg %p598_p8 }
  0x46   : > { %458 = vmatmul.mubr.msk.bf16.vlgmr.msra.gmra.mxu0 %vm262_vm1, %v238_v4  ;;  %p605_p3 = por %p604_p2, %p603_p0 }
  0x48   : > { %p606_p5 = pnand %p605_p3, %p599_p10 }
 0x106   : > { %v300_v6 = vpop.f32.mrf.mxu0 }
 0x107   : > { %v301_v7 = vadd.f32 %v442_v5, %v300_v6 }
 0x108   : > { %v459_v8 = vpop.f32.mrf.mxu0 }
 0x109   : > { %v307_v9 = vmul.f32 0.70710677, %v301_v7  ;;  %v306_v13 = vmul.f32 0.5, %v301_v7 }
 0x10a   : > { %v303_v10 = vpop.f32.mrf.mxu0 }
 0x10b   : > { %540 = verf.f32 %v307_v9 }
 0x10c   : > { %v460_v11 = vpop.f32.mrf.mxu0 }
 0x118   : > { %v541_v12 = vpop.eup %540 }
 0x119   : > { %v309_v14 = vadd.f32 1.0, %v541_v12 }
 0x11b   : > { %v310_v15 = vmul.f32 %v309_v14, %v306_v13 }
 0x11d   : > { %311 = vst [vmem:[%s232_s27] sm:$0xff] %v310_v15 }
 0x11e   : > { %609 = shalt.err (!%p606_p5)
}
 0x11f   : > { %s610_s25 = scalar_lea.hbm %s325_s21, 128  ;;  %s614_s18 = scalar_lea.hbm %s886_s3, 256 }
 0x120   : > { %p611_p7 = scmp.ne.s32.totalorder %s325_s21, %s610_s25  ;;  %p615_p9 = scmp.lt.s32.totalorder %s325_s21, %s886_s3 }
 0x121   : > { %p616_p11 = scmp.lt.s32.totalorder %s614_s18, %s610_s25 }
 0x122   : > { %p612_p6 = pnand %p611_p7, %p796_p13 }
 0x123   : > { %p617_p12 = por %p616_p11, %p615_p9 }
 0x124   : > { %p613_p4 = pneg %p612_p6 }
 0x126   : > { %p618_p1 = pnand %p617_p12, %p613_p4 }
 0x128   : > { %621 = shalt.err (!%p618_p1)
}
 0x129   : > { %467 = dma.vmem_to_hbm [thread:$0]  (%p796_p13), %s328_s29, 128, %s325_s21, %s313_s5  }
 0x12a PF: > { %s339_s24 = sand.u32 1, %s660_s12   ;;  %p898_p8 = scmp.ne.s32.totalorder %s891_s23, 0 }
 0x12b   : > { %p899_p10 = scmp.ge.s32.totalorder %s680_s17, 2  ;;  %s340_s20 = scalar_lea.sflag [#allocation4], %s339_s24 }
 0x12d   : > { %p478_p0 = pnand %p899_p10, %p898_p8 }
 0x12f   : > { %p479_p2 = pneg %p478_p0 }
 0x131   : > { %655 = dma.done.wait (%p479_p2), %s340_s20, 128  }
 0x132   : > { %657 = vsyncadd (%p479_p2), %s340_s20, 4294967168  ;;  %s20_s17 = sadd.s32 1, %s680_s17   ;;  %s900_s12 = smov %s664_s13 }
 0x133   : > { %p17_p3 = scmp.ge.s32.totalorder %s20_s17, 4   ;;  %s901_s13 = smov %s668_s14 }
 0x134   : > { %s902_s14 = smov %s805_s19  ;;  %s903_s15 = smov %s676_s16 }
 0x135   : > { %s904_s16 = smov %s906_s28  ;;  %19 = sbr.rel (!%p17_p3) target bundleno = 7 (0x7), region = 85 }
 0x13a   :  { %345 = vsyncpa [#allocation3], 1 }
 0x13b   :  { %347 = vsyncpa [#allocation3 + $0x1], 1 }
 0x13c   :  { %348 = vsyncpa [#allocation6], 1 }
 0x13d   :  { %349 = vsyncpa [#allocation4], 1 }
 0x13e   :  { %351 = vsyncpa [#allocation4 + $0x1], 1 }

</bundles_post_ra>
